<compile_context>
chip_gen: v6e
topology: v6e:2x2x1
jax: 0.10.0
libtpu: 0.0.40
codegen_flags: <defaults>
</compile_context>

<pallas_src>
import jax
import jax.numpy as jnp
from jax.experimental import pallas as pl
from jax.experimental.pallas import tpu as pltpu


def _round_up(x, m):
    return ((x + m - 1) // m) * m


def _cdiv(a, b):
    return (a + b - 1) // b


def _vmem_capacity_bytes():
    try:
        return int(pltpu.get_tpu_info().vmem_capacity_bytes)
    except Exception:
        return 64 << 20  # conservative (v7x-sized); safe on every generation


def _sublane_for_itemsize(nbytes):
    if nbytes >= 4:
        return 8
    if nbytes == 2:
        return 16
    return 32


def _pick_inter_tile(inter, target):
    """Return (tj, inter_pad). tj is a multiple of 128 (or == inter)."""
    target = max(256, (target // 128) * 128)
    if inter <= target:
        return inter, inter
    t = target
    while t >= 256:
        if inter % t == 0:
            return t, inter
        t -= 128
    # No clean divisor: zero-pad the intermediate dim. Padded W1 columns with
    # zero bias give relu(0)=0, which contributes exactly zero through W2.
    return target, _round_up(inter, target)


def _estimate_vmem(tm, tj, C, bx, bw, bo, use_acc):
    # Double-buffered input/output blocks + hidden activation (f32 + cast
    # copy) + optional f32 accumulator + Mosaic internal scratch headroom.
    blocks = 2 * (tm * C * bx            # x tile
                  + C * tj * bw          # W1 slab
                  + tj * 4               # b1 slice (f32)
                  + tj * C * bw          # W2 slab
                  + C * 4                # b2 (f32)
                  + tm * C * bo)         # output tile
    hidden = tm * tj * 4 + tm * tj * bw
    acc = tm * C * 4 if use_acc else 0
    return blocks + hidden + acc + (2 << 20)


def _mlp_kernel_f32_out(x_ref, w1_ref, b1_ref, w2_ref, b2_ref, o_ref):
    # Output dtype is f32: accumulate directly into the resident output block.
    j = pl.program_id(1)
    h = jnp.dot(x_ref[...], w1_ref[...], preferred_element_type=jnp.float32)
    h = jnp.maximum(h + b1_ref[...], 0.0)
    part = jnp.dot(h.astype(w2_ref.dtype), w2_ref[...],
                   preferred_element_type=jnp.float32)

    @pl.when(j == 0)
    def _():
        o_ref[...] = part + b2_ref[...]

    @pl.when(j != 0)
    def _():
        o_ref[...] += part


def _mlp_kernel_acc(x_ref, w1_ref, b1_ref, w2_ref, b2_ref, o_ref, acc_ref):
    # Narrow output dtype: keep an f32 VMEM accumulator, cast on finalize.
    j = pl.program_id(1)

    @pl.when(j == 0)
    def _():
        acc_ref[...] = jnp.zeros_like(acc_ref)

    h = jnp.dot(x_ref[...], w1_ref[...], preferred_element_type=jnp.float32)
    h = jnp.maximum(h + b1_ref[...], 0.0)
    acc_ref[...] += jnp.dot(h.astype(w2_ref.dtype), w2_ref[...],
                            preferred_element_type=jnp.float32)

    @pl.when(j == pl.num_programs(1) - 1)
    def _():
        o_ref[...] = (acc_ref[...] + b2_ref[...]).astype(o_ref.dtype)


def gpt_neox_mlp(x, w1, b1, w2, b2, *, compute_dtype=jnp.bfloat16,
                 tm=None, tj=None):
    """x: [B, T, n_embd] -> [B, T, n_embd].  quant=False forward of GptNeoxMLP."""
    B, T, C = x.shape
    C_in, inter = w1.shape
    assert C_in == C and w2.shape == (inter, C)
    assert b1.shape == (inter,) and b2.shape == (C,)
    M = B * T
    out_dtype = x.dtype
    out_is_f32 = (out_dtype == jnp.float32)

    if compute_dtype is not None:
        x = x.astype(compute_dtype)
        w1 = w1.astype(compute_dtype)
        w2 = w2.astype(compute_dtype)

    bx = x.dtype.itemsize
    bw = w1.dtype.itemsize
    bo = jnp.dtype(out_dtype).itemsize
    sub = max(_sublane_for_itemsize(bx), _sublane_for_itemsize(bo))

    vmem_cap = _vmem_capacity_bytes()
    big_vmem = vmem_cap >= (100 << 20)          # v5e/v6e (128 MiB) vs v7x (64 MiB)
    budget = min(vmem_cap - (8 << 20), (vmem_cap * 7) // 8)

    # ---- tile plan: generation-specific targets, shrunk until they fit ----
    tm_cands = ([tm] if tm else
                ([1024, 768, 512, 384, 256, 128, 64] if big_vmem
                 else [512, 384, 256, 128, 64]))
    tj_cands = ([tj] if tj else ([1024, 512, 256] if big_vmem else [256, 512]))
    tm_cap = _round_up(M, sub)
    plan = None
    for tm_t in tm_cands:
        tm_e = min(_round_up(max(tm_t, sub), sub), tm_cap)
        for tj_t in tj_cands:
            tj_e, inter_pad = _pick_inter_tile(inter, tj_t)
            if _estimate_vmem(tm_e, tj_e, C, bx, bw, bo, not out_is_f32) <= budget:
                plan = (tm_e, tj_e, inter_pad)
                break
        if plan is not None:
            break
    if plan is None:
        tj_e, inter_pad = _pick_inter_tile(inter, 256)
        plan = (min(sub, tm_cap), tj_e, inter_pad)
    tm_e, tj_e, inter_pad = plan

    # v7x (64 MiB proxy): keep >= 2 i-steps so both TensorCores get work.
    if (not big_vmem) and M >= 2 * sub:
        tm_e = max(sub, min(tm_e, _round_up(_cdiv(M, 2), sub)))

    # Prefer a row tile that divides M exactly (avoids a padded copy of x),
    # as long as it stays at least half of the planned tile.
    if M % tm_e != 0:
        t = (tm_e // sub) * sub
        while t >= sub and M % t != 0:
            t -= sub
        if t >= sub and M % t == 0 and 2 * t >= tm_e:
            tm_e = t

    M_pad = _round_up(M, tm_e)

    x2d = x.reshape(M, C)
    if M_pad != M:
        # TODO(synk): a masked final store could avoid this padded copy; the
        # pad is only hit when no reasonable divisor of M exists.
        x2d = jnp.pad(x2d, ((0, M_pad - M), (0, 0)))

    b1_2d = b1.reshape(1, inter).astype(jnp.float32)
    b2_2d = b2.reshape(1, C).astype(jnp.float32)
    if inter_pad != inter:
        w1 = jnp.pad(w1, ((0, 0), (0, inter_pad - inter)))
        b1_2d = jnp.pad(b1_2d, ((0, 0), (0, inter_pad - inter)))
        w2 = jnp.pad(w2, ((0, inter_pad - inter), (0, 0)))

    n_i = M_pad // tm_e
    n_j = inter_pad // tj_e

    est = _estimate_vmem(tm_e, tj_e, C, bx, bw, bo, not out_is_f32)
    vmem_limit = int(min(max(est + (4 << 20), 32 << 20), budget))

    cost = pl.CostEstimate(
        flops=4 * M_pad * C * inter_pad,
        transcendentals=0,
        bytes_accessed=(M_pad * C * (bx + bo)
                        + n_i * (C * inter_pad * bw + inter_pad * C * bw)
                        + inter_pad * 4 + C * 4),
    )

    kernel = _mlp_kernel_f32_out if out_is_f32 else _mlp_kernel_acc
    scratch = [] if out_is_f32 else [pltpu.VMEM((tm_e, C), jnp.float32)]

    out2d = pl.pallas_call(
        kernel,
        out_shape=jax.ShapeDtypeStruct((M_pad, C), out_dtype),
        grid_spec=pltpu.PrefetchScalarGridSpec(
            num_scalar_prefetch=0,
            grid=(n_i, n_j),
            in_specs=[
                pl.BlockSpec((tm_e, C), lambda i, j: (i, 0)),   # x (resident over j)
                pl.BlockSpec((C, tj_e), lambda i, j: (0, j)),   # W1 slab
                pl.BlockSpec((1, tj_e), lambda i, j: (0, j)),   # b1 slice
                pl.BlockSpec((tj_e, C), lambda i, j: (j, 0)),   # W2 slab
                pl.BlockSpec((1, C), lambda i, j: (0, 0)),      # b2
            ],
            out_specs=pl.BlockSpec((tm_e, C), lambda i, j: (i, 0)),
            scratch_shapes=scratch,
        ),
        compiler_params=pltpu.CompilerParams(
            dimension_semantics=("parallel", "arbitrary"),
            vmem_limit_bytes=vmem_limit,
        ),
        cost_estimate=cost,
    )(x2d, w1, b1_2d, w2, b2_2d)

    return out2d[:M].reshape(B, T, C)


if __name__ == "__main__":
    # Small config: n_embd=32, intermediate_size=128, bias=True
    B, T, n_embd, inter = 2, 8, 32, 128

    key = jax.random.PRNGKey(0)
    kx, kw1, kb1, kw2, kb2 = jax.random.split(key, 5)

    x = jax.random.normal(kx, (B, T, n_embd), dtype=jnp.float32)
    # Deterministic synthetic parameters (Linear weights transposed to [in, out]).
    w1 = jax.random.normal(kw1, (n_embd, inter), dtype=jnp.float32) * 0.05
    b1 = jax.random.normal(kb1, (inter,), dtype=jnp.float32) * 0.05
    w2 = jax.random.normal(kw2, (inter, n_embd), dtype=jnp.float32) * 0.05
    b2 = jax.random.normal(kb2, (n_embd,), dtype=jnp.float32) * 0.05

    # Reference (plain JAX) forward semantics.
    h_ref = jnp.maximum(x.reshape(-1, n_embd) @ w1 + b1, 0.0)
    ref = (h_ref @ w2 + b2).reshape(B, T, n_embd)

    # Exact f32 compute path (tight tolerance).
    out_f32 = jax.block_until_ready(
        gpt_neox_mlp(x, w1, b1, w2, b2, compute_dtype=jnp.float32))
    assert out_f32.shape == (B, T, n_embd)
    assert jnp.allclose(out_f32, ref, atol=1e-5, rtol=1e-5)

    # Default bf16 MXU path, f32 input/output (loose tolerance: h is cast to
    # bf16 before the second matmul; accumulation stays f32).
    out_bf16 = jax.block_until_ready(gpt_neox_mlp(x, w1, b1, w2, b2))
    assert jnp.allclose(out_bf16, ref, atol=5e-2, rtol=5e-2)

    # bf16 input/output (exercises the scratch-accumulator kernel variant).
    out_bf16_io = jax.block_until_ready(
        gpt_neox_mlp(x.astype(jnp.bfloat16), w1, b1, w2, b2))
    assert out_bf16_io.dtype == jnp.bfloat16
    assert jnp.allclose(out_bf16_io.astype(jnp.float32), ref, atol=5e-2, rtol=5e-2)

    print("KERNEL_OK")
</pallas_src>

<mosaic_0001>
module attributes {stable_mosaic.version = 11 : i64} {
  func.func @_mlp_kernel_f32_out(%arg0: i32, %arg1: i32, %arg2: memref<8x32xf32, #tpu.memory_space<vmem>>, %arg3: memref<32x128xf32, #tpu.memory_space<vmem>>, %arg4: memref<1x128xf32, #tpu.memory_space<vmem>>, %arg5: memref<128x32xf32, #tpu.memory_space<vmem>>, %arg6: memref<1x32xf32, #tpu.memory_space<vmem>>, %arg7: memref<8x32xf32, #tpu.memory_space<vmem>>) attributes {dimension_semantics = [#tpu.dimension_semantics<parallel>, #tpu.dimension_semantics<arbitrary>], iteration_bounds = array<i64: 2, 1>, scalar_prefetch = 0 : i64, scratch_operands = 0 : i64, tpu.core_type = #tpu.core_type<tc>, window_params = [{transform_indices = @transform_0, window_bounds = array<i64: 8, 32>}, {transform_indices = @transform_1, window_bounds = array<i64: 32, 128>}, {transform_indices = @transform_2, window_bounds = array<i64: 1, 128>}, {transform_indices = @transform_3, window_bounds = array<i64: 128, 32>}, {pipeline_mode = #tpu.pipeline_mode<synchronous>, transform_indices = @transform_4, window_bounds = array<i64: 1, 32>}, {transform_indices = @transform_5, window_bounds = array<i64: 8, 32>}]} {
    %c0 = arith.constant 0 : index
    %c0_0 = arith.constant 0 : index
    %0 = vector.load %arg2[%c0, %c0_0] : memref<8x32xf32, #tpu.memory_space<vmem>>, vector<8x32xf32>
    %c0_1 = arith.constant 0 : index
    %c0_2 = arith.constant 0 : index
    %1 = vector.load %arg3[%c0_1, %c0_2] : memref<32x128xf32, #tpu.memory_space<vmem>>, vector<32x128xf32>
    %cst = arith.constant dense<0.000000e+00> : vector<8x128xf32>
    %2 = tpu.matmul %0, %1, %cst {dimension_numbers = #tpu.dot_dimension_numbers<[1], [0], [0], [1], [0, 0, 1, 1], [], []>} : vector<8x32xf32>, vector<32x128xf32>, vector<8x128xf32> -> vector<8x128xf32>
    %c0_3 = arith.constant 0 : index
    %c0_4 = arith.constant 0 : index
    %3 = vector.load %arg4[%c0_3, %c0_4] : memref<1x128xf32, #tpu.memory_space<vmem>>, vector<1x128xf32>
    %4 = vector.broadcast %3 : vector<1x128xf32> to vector<8x128xf32>
    %5 = arith.addf %2, %4 : vector<8x128xf32>
    %cst_5 = arith.constant 0.000000e+00 : f32
    %6 = vector.broadcast %cst_5 : f32 to vector<8x128xf32>
    %7 = arith.maximumf %5, %6 : vector<8x128xf32>
    %c0_6 = arith.constant 0 : index
    %c0_7 = arith.constant 0 : index
    %8 = vector.load %arg5[%c0_6, %c0_7] : memref<128x32xf32, #tpu.memory_space<vmem>>, vector<128x32xf32>
    %cst_8 = arith.constant dense<0.000000e+00> : vector<8x32xf32>
    %9 = tpu.matmul %7, %8, %cst_8 {dimension_numbers = #tpu.dot_dimension_numbers<[1], [0], [0], [1], [0, 0, 1, 1], [], []>} : vector<8x128xf32>, vector<128x32xf32>, vector<8x32xf32> -> vector<8x32xf32>
    %c0_i32 = arith.constant 0 : i32
    %10 = arith.cmpi eq, %arg1, %c0_i32 : i32
    %11 = arith.extui %10 : i1 to i32
    %c0_i32_9 = arith.constant 0 : i32
    %12 = arith.cmpi ne, %11, %c0_i32_9 : i32
    scf.if %12 {
      %c0_12 = arith.constant 0 : index
      %c0_13 = arith.constant 0 : index
      %16 = vector.load %arg6[%c0_12, %c0_13] : memref<1x32xf32, #tpu.memory_space<vmem>>, vector<1x32xf32>
      %17 = vector.broadcast %16 : vector<1x32xf32> to vector<8x32xf32>
      %18 = arith.addf %9, %17 : vector<8x32xf32>
      %c0_14 = arith.constant 0 : index
      %c0_15 = arith.constant 0 : index
      %19 = vector.load %arg7[%c0_14, %c0_15] : memref<8x32xf32, #tpu.memory_space<vmem>>, vector<8x32xf32>
      tpu.vector_store %arg7[%c0_14, %c0_15], %18 {strides = array<i32>} : memref<8x32xf32, #tpu.memory_space<vmem>>, vector<8x32xf32>,
    } else {
    }
    %c0_i32_10 = arith.constant 0 : i32
    %13 = arith.cmpi ne, %arg1, %c0_i32_10 : i32
    %14 = arith.extui %13 : i1 to i32
    %c0_i32_11 = arith.constant 0 : i32
    %15 = arith.cmpi ne, %14, %c0_i32_11 : i32
    scf.if %15 {
      %c0_12 = arith.constant 0 : index
      %c0_13 = arith.constant 0 : index
      %16 = vector.load %arg7[%c0_12, %c0_13] : memref<8x32xf32, #tpu.memory_space<vmem>>, vector<8x32xf32>
      %17 = arith.addf %16, %9 : vector<8x32xf32>
      %c0_14 = arith.constant 0 : index
      %c0_15 = arith.constant 0 : index
      %18 = vector.load %arg7[%c0_14, %c0_15] : memref<8x32xf32, #tpu.memory_space<vmem>>, vector<8x32xf32>
      tpu.vector_store %arg7[%c0_14, %c0_15], %17 {strides = array<i32>} : memref<8x32xf32, #tpu.memory_space<vmem>>, vector<8x32xf32>,
    } else {
    }
    return
  }
  func.func @transform_0(%arg0: i32, %arg1: i32) -> (i32, i32) {
    %c0_i32 = arith.constant 0 : i32
    %c0_i32_0 = arith.constant 0 : i32
    return %arg0, %c0_i32 : i32, i32
  }
  func.func @transform_1(%arg0: i32, %arg1: i32) -> (i32, i32) {
    %c0_i32 = arith.constant 0 : i32
    %c0_i32_0 = arith.constant 0 : i32
    return %c0_i32, %arg1 : i32, i32
  }
  func.func @transform_2(%arg0: i32, %arg1: i32) -> (i32, i32) {
    %c0_i32 = arith.constant 0 : i32
    %c0_i32_0 = arith.constant 0 : i32
    return %c0_i32, %arg1 : i32, i32
  }
  func.func @transform_3(%arg0: i32, %arg1: i32) -> (i32, i32) {
    %c0_i32 = arith.constant 0 : i32
    %c0_i32_0 = arith.constant 0 : i32
    return %arg1, %c0_i32 : i32, i32
  }
  func.func @transform_4(%arg0: i32, %arg1: i32) -> (i32, i32) {
    %c0_i32 = arith.constant 0 : i32
    %c0_i32_0 = arith.constant 0 : i32
    %c0_i32_1 = arith.constant 0 : i32
    return %c0_i32, %c0_i32_0 : i32, i32
  }
  func.func @transform_5(%arg0: i32, %arg1: i32) -> (i32, i32) {
    %c0_i32 = arith.constant 0 : i32
    %c0_i32_0 = arith.constant 0 : i32
    return %arg0, %c0_i32 : i32, i32
  }
}

</mosaic_0001>

<bundles_post_ra>
// kernel: tpu_custom_call.1
= control target key start
LH: loop header
LB: loop body
LE: loop exit
PB: predicated region body
PF: predicated region fallthrough
CT: control target
= control target key end

     0   :  { %10 = vsyncpa [#allocation3], 0  ;;  %s1051_s0 = inlined_call_operand.vmem [shape: f32[16,32], index: 0, kind: input, shape index: {}]   ;;  %s1052_s1 = inlined_call_operand.vmem [shape: f32[32,128], index: 1, kind: input, shape index: {}]   ;;  %s1053_s2 = inlined_call_operand.vmem [shape: f32[1,128], index: 2, kind: input, shape index: {}]   ;;  %s1054_s3 = inlined_call_operand.vmem [shape: f32[128,32], index: 3, kind: input, shape index: {}]   ;;  %s1055_s4 = inlined_call_operand.vmem [shape: f32[1,32], index: 4, kind: input, shape index: {}]   ;;  %s1056_s5 = inlined_call_operand.hbm [shape: f32[16,32], index: 5, kind: output, shape index: {}]  }
   0x1   :  { %12 = vsyncpa [#allocation3 + $0x1], 0  ;;  %s854_s18 = smov 0   ;;  %s856_s19 = smov 0  }
   0x2   :  { %s858_s20 = smov 0   ;;  %s860_s21 = smov 0  }
   0x3   :  { %s862_s22 = smov 0   ;;  %s864_s23 = smov 0  }
   0x4 LB: > { %s601_s24 = sadd.s32 4294967295, %s819_s23   ;;  %s602_s25 = sadd.s32 4294967294, %s819_s23   ;;  %s819_s23 = sphi %s864_s23, %s18_s23   ;;  %s815_s22 = sphi %s862_s22, %s1063_s22   ;;  %s811_s21 = sphi %s860_s21, %s1062_s21   ;;  %s807_s20 = sphi %s858_s20, %s1061_s20   ;;  %s803_s19 = sphi %s856_s19, %s1060_s19   ;;  %s799_s18 = sphi %s854_s18, %s1059_s18  }
   0x5   : > { %s30_s26 = sadd.s32 1, %s815_s22  ;;  %s162_s27 = sadd.s32 1, %s807_s20 }
   0x6   : > { %p32_p0 = scmp.ge.s32.totalorder %s30_s26, 2  ;;  %p172_p1 = scmp.ne.s32.totalorder %s807_s20, %s803_s19 }
   0x7   : > { %p173_p2 = scmp.eq.s32.totalorder %s601_s24, 1  ;;  %p178_p3 = scmp.ne.s32.totalorder %s803_s19, %s799_s18 }
   0x8   : > { %s1065_s26 = smov (%p32_p0, %s30_s26), 0  ;;  %p179_p5 = scmp.eq.s32.totalorder %s602_s25, 1 }
   0x9   : > { %p894_p4 = por %p173_p2, %p172_p1  ;;  %s159_s29 = ssub.s32 %s815_s22, %s1065_s26 }
   0xa   : > { %p608_p6 = scmp.ge.s32.totalorder %s819_s23, 1  ;;  %p160_p7 = scmp.eq.s32.totalorder %s159_s29, 0 }
   0xb   : > { %p901_p8 = por %p179_p5, %p178_p3  ;;  %p229_p9 = scmp.lt.s32.totalorder %s819_s23, 3 }
   0xc   : > { %s907_s6 = scalar_select %p160_p7, %s807_s20, %s162_s27  }
   0xd   : > { %p230_p10 = pnand %p608_p6, %p229_p9 }
   0xe   : > { %p268_p11 = scmp.lt.s32.totalorder (!%p230_p10), %s811_s21, 1  ;;  %s265_s9 = sand.u32 (!%p230_p10), 1, %s803_s19  }
   0xf   : > { %233 = sbr.rel (%p230_p10) target bundleno = 434 (0x1b2), region = 40  ;;  %s479_s25 = scalar_lea.sflag (!%p230_p10), [#allocation3], %s265_s9 }
  0x14   : > { %v289_v0 = vld [vmem:[%s1052_s1 + $0x18] sm:$0xff]  ;;  %v821_v1 = vmov 0.0   ;;  %v288_v2 = vld [vmem:[%s1052_s1 + $0x10] sm:$0xff]  ;;  %vm822_vm0 = vmmov 0   ;;  %s269_s13 = scalar_select %p268_p11, %s811_s21, 1  ;;  %v287_v5 = vld [vmem:[%s1052_s1 + $0x8] sm:$0xff] }
  0x15   : > { %640 = vmatprep.subr.mxu0 %v821_v1  ;;  %648 = vmatprep.mubr.msk.f32.mxu0 %vm822_vm0, %v821_v1  ;;  %v387_v3 = vld [vmem:[%s1054_s3 + $0x78] sm:$0xff]  ;;  %v386_v4 = vld [vmem:[%s1054_s3 + $0x70] sm:$0xff]  ;;  %v385_v6 = vld [vmem:[%s1054_s3 + $0x68] sm:$0xff]  ;;  %vm297_vm1 = vcmask 261120  }
  0x16   : > { %641 = vmatpush3.msra.mxu0 %v289_v0  ;;  %651 = vmatprep.subr.mxu1 %v821_v1  ;;  %s610_s24 = sshll.u32 %s269_s13, 3  ;;  %v286_v7 = vld [vmem:[%s1052_s1] sm:$0xff]  ;;  %v383_v10 = vld [vmem:[%s1054_s3 + $0x58] sm:$0xff]  ;;  %v382_v11 = vld [vmem:[%s1054_s3 + $0x50] sm:$0xff]  ;;  %s615_s13 = sshll.u32 %s811_s21, 7 }
  0x17   : > { %642 = vmatprep.subr.mxu0 %v821_v1  ;;  %652 = vmatpush3.msra.mxu1 %v387_v3  ;;  %s271_s10 = scalar_lea.vmem %s1051_s0, %s610_s24  ;;  %v384_v9 = vld [vmem:[%s1054_s3 + $0x60] sm:$0xff]  ;;  %v381_v12 = vld [vmem:[%s1054_s3 + $0x48] sm:$0xff]  ;;  %v379_v14 = vld [vmem:[%s1054_s3 + $0x38] sm:$0xff]  ;;  %s1010_s24 = scalar_lea.hbm %s1056_s5, %s615_s13 }
  0x18   : > { %643 = vmatpush3.msra.mxu0 %v288_v2  ;;  %653 = vmatprep.subr.mxu1 %v821_v1  ;;  %v285_v8 = vld [vmem:[%s271_s10] sm:$0xff]  ;;  %v378_v15 = vld [vmem:[%s1054_s3 + $0x30] sm:$0xff]  ;;  %v377_v16 = vld [vmem:[%s1054_s3 + $0x28] sm:$0xff]  ;;  %s609_s10 = sshll.u32 %s265_s9, 3  ;;  %s823_s21 = smov [#allocation2]  }
  0x19   : > { %644 = vmatprep.subr.mxu0 %v821_v1  ;;  %654 = vmatpush3.msra.mxu1 %v386_v4  ;;  %v380_v13 = vld [vmem:[%s1054_s3 + $0x40] sm:$0xff]  ;;  %v375_v18 = vld [vmem:[%s1054_s3 + $0x18] sm:$0xff]  ;;  %v374_v19 = vld [vmem:[%s1054_s3 + $0x10] sm:$0xff]  ;;  %s267_s14 = scalar_lea.vmem [#allocation2], %s609_s10  ;;  %s747_s29 = sshll.u32 %s823_s21, 4  ;;  %s748_s29 = int_to_ptr.vmem [resolvable:$false] %s747_s29 }
  0x1a   : > { %645 = vmatpush3.msra.mxu0 %v287_v5  ;;  %655 = vmatprep.subr.mxu1 %v821_v1  ;;  %v376_v17 = vld [vmem:[%s1054_s3 + $0x20] sm:$0xff]  ;;  %v373_v20 = vld [vmem:[%s1054_s3 + $0x8] sm:$0xff]  ;;  %s492_s15 = sshll.u32 %s267_s14, 4  ;;  %s749_s7 = scalar_lea.vmem %s748_s29, 256  ;;  %s493_s15 = int_to_ptr.vmem [resolvable:$true] %s492_s15 }
  0x1b   : > { %646 = vmatprep.subr.mxu0 %v821_v1  ;;  %656 = vmatpush3.msra.mxu1 %v385_v6  ;;  %v372_v21 = vld [vmem:[%s1054_s3] sm:$0xff]  ;;  %s743_s27 = scalar_lea.vmem %s493_s15, 128  ;;  %p750_p1 = scmp.lt.s32.totalorder %s493_s15, %s748_s29 }
  0x1c   : > { %647 = vmatpush3.msra.mxu0 %v286_v7  ;;  %657 = vmatprep.subr.mxu1 %v821_v1  ;;  %v611_v22 = vld [vmem:[%s1053_s2] ss:$0 sm:$0xff]  ;;  %p744_p12 = scmp.ne.s32.totalorder %s493_s15, %s743_s27  ;;  %p751_p2 = scmp.lt.s32.totalorder %s749_s7, %s743_s27 }
  0x1d   : > { %649 = vmatmul.mubr.msk.f32.vlgmr.msra.gmra.mxu0 %vm297_vm1, %v285_v8  ;;  %658 = vmatpush3.msra.mxu1 %v384_v9  ;;  %v613_v27 = vld [vmem:[%s1055_s4] ss:$0 sm:$0xff] }
  0x1e   : > { %659 = vmatprep.subr.mxu1 %v821_v1  ;;  %683 = vmatprep.mubr.msk.f32.mxu1 %vm822_vm0, %v821_v1  ;;  %p745_p13 = pnand %p744_p12, %p894_p4  ;;  %p752_p3 = por %p751_p2, %p750_p1 }
  0x1f   : > { %660 = vmatpush3.msra.mxu1 %v383_v10 }
  0x20   : > { %661 = vmatprep.subr.mxu1 %v821_v1  ;;  %p746_p0 = pneg %p745_p13 }
  0x21   : > { %662 = vmatpush3.msra.mxu1 %v382_v11 }
  0x22   : > { %663 = vmatprep.subr.mxu1 %v821_v1  ;;  %p753_p5 = pnand %p752_p3, %p746_p0 }
  0x23   : > { %664 = vmatpush3.msra.mxu1 %v381_v12 }
  0x24   : > { %665 = vmatprep.subr.mxu1 %v821_v1 }
  0x25   : > { %666 = vmatpush3.msra.mxu1 %v380_v13 }
  0x26   : > { %667 = vmatprep.subr.mxu1 %v821_v1 }
  0x27   : > { %668 = vmatpush3.msra.mxu1 %v379_v14 }
  0x28   : > { %669 = vmatprep.subr.mxu1 %v821_v1 }
  0x29   : > { %670 = vmatpush3.msra.mxu1 %v378_v15 }
  0x2a   : > { %671 = vmatprep.subr.mxu1 %v821_v1 }
  0x2b   : > { %672 = vmatpush3.msra.mxu1 %v377_v16 }
  0x2c   : > { %673 = vmatprep.subr.mxu1 %v821_v1 }
  0x2d   : > { %674 = vmatpush3.msra.mxu1 %v376_v17 }
  0x2e   : > { %675 = vmatprep.subr.mxu1 %v821_v1 }
  0x2f   : > { %676 = vmatpush3.msra.mxu1 %v375_v18 }
  0x30   : > { %677 = vmatprep.subr.mxu1 %v821_v1 }
  0x31   : > { %678 = vmatpush3.msra.mxu1 %v374_v19 }
  0x32   : > { %679 = vmatprep.subr.mxu1 %v821_v1 }
  0x33   : > { %680 = vmatpush3.msra.mxu1 %v373_v20 }
  0x34   : > { %681 = vmatprep.subr.mxu1 %v821_v1 }
  0x35   : > { %682 = vmatpush3.msra.mxu1 %v372_v21 }
  0xdd   : > { %v367_v23 = vpop.f32.mrf.mxu0 }
  0xde   : > { %v368_v24 = vadd.f32 %v611_v22, %v367_v23 }
  0xdf   : > { %v650_v25 = vpop.f32.mrf.mxu0 }
  0xe0   : > { %v371_v26 = vmax.f32 %v368_v24, 0.0 }
  0xe2   : > { %684 = vmatmul.mubr.f32.vlgmr.msra.gmra.mxu1 %v371_v26 }
 0x1a2   : > { %v454_v28 = vpop.f32.mrf.mxu1 }
 0x1a3   : > { %v469_v29 = vadd.f32 %v613_v27, %v454_v28 }
 0x1a4   : > { %v685_v30 = vpop.f32.mrf.mxu1 }
 0x1a5   : > { %470 = vst.msk [vmem:[%s267_s14] sm:$0xff] %vm297_vm1, %v469_v29 }
 0x1a6   : > { %756 = shalt.err (!%p753_p5)
}
 0x1a7   : > { %s757_s8 = scalar_lea.hbm %s1010_s24, 128  ;;  %s761_s11 = scalar_lea.hbm %s1056_s5, 256 }
 0x1a8   : > { %p758_p6 = scmp.ne.s32.totalorder %s1010_s24, %s757_s8  ;;  %p762_p10 = scmp.lt.s32.totalorder %s1010_s24, %s1056_s5 }
 0x1a9   : > { %p763_p11 = scmp.lt.s32.totalorder %s761_s11, %s757_s8 }
 0x1aa   : > { %p759_p7 = pnand %p758_p6, %p894_p4 }
 0x1ab   : > { %p764_p12 = por %p763_p11, %p762_p10 }
 0x1ac   : > { %p760_p9 = pneg %p759_p7 }
 0x1ae   : > { %p765_p13 = pnand %p764_p12, %p760_p9 }
 0x1b0   : > { %768 = shalt.err (!%p765_p13)
}
 0x1b1   : > { %686 = dma.vmem_to_hbm [thread:$0]  (%p894_p4), %s493_s15, 128, %s1010_s24, %s479_s25  }
 0x1b2 PF: > { %p692_p0 = scmp.ge.s32.totalorder %s819_s23, 2  ;;  %s504_s14 = sand.u32 1, %s799_s18  }
 0x1b3   : > { %s505_s16 = scalar_lea.sflag [#allocation3], %s504_s14 }
 0x1b4   : > { %p689_p1 = pnand %p692_p0, %p901_p8 }
 0x1b6   : > { %p690_p2 = pneg %p689_p1 }
 0x1b8   : > { %794 = dma.done.wait (%p690_p2), %s505_s16, 128  }
 0x1b9   : > { %796 = vsyncadd (%p690_p2), %s505_s16, 4294967168  ;;  %s18_s23 = sadd.s32 1, %s819_s23   ;;  %s1059_s18 = smov %s803_s19 }
 0x1ba   : > { %p15_p3 = scmp.ge.s32.totalorder %s18_s23, 4   ;;  %s1060_s19 = smov %s807_s20 }
 0x1bb   : > { %s1061_s20 = smov %s907_s6  ;;  %s1062_s21 = smov %s815_s22 }
 0x1bc   : > { %s1063_s22 = smov %s1065_s26  ;;  %17 = sbr.rel (!%p15_p3) target bundleno = 4 (0x4), region = 92 }
 0x1c1   :  { %510 = vsyncpa [#allocation3], 1 }
 0x1c2   :  { %512 = vsyncpa [#allocation3 + $0x1], 1 }

</bundles_post_ra>
